<compile_context>
chip_gen: v7x
topology: tpu7x:2x2x1
jax: 0.10.0
libtpu: 0.0.40
codegen_flags: <defaults>
</compile_context>

<pallas_src>
import jax
import jax.numpy as jnp
from jax.experimental import pallas as pl
from jax.experimental.pallas import tpu as pltpu


def _round_up(x: int, m: int) -> int:
    return ((x + m - 1) // m) * m


def _sublane_multiple(dtype) -> int:
    """Sublane packing granularity: 8 for 32-bit, 16 for 16-bit, 32 for 8-bit dtypes."""
    bits = jnp.dtype(dtype).itemsize * 8
    return max(8, 256 // bits)


def _vmem_budgets() -> tuple[int, int]:
    """(per-tile working-set budget, vmem_limit_bytes), generation-aware."""
    cap = 64 * 1024 * 1024
    try:
        cap = int(getattr(pltpu.get_tpu_info(), "vmem_capacity_bytes", cap))
    except Exception:
        pass
    if cap >= 96 * 1024 * 1024:
        # v5e / v6e: 128 MiB VMEM -> big tiles, fewer grid steps (HBM-bound regime).
        return 48 * 1024 * 1024, 100 * 1024 * 1024
    # v7x: 64 MiB physical VMEM per core.
    return 22 * 1024 * 1024, 48 * 1024 * 1024


def _choose_block_rows(c_pad: int, itemsize: int, batch: int, sublane: int, budget: int) -> int:
    """Pick a batch-tile size that keeps the working set inside the per-generation budget."""
    # 2 inputs x 2 pipeline buffers at input dtype + ~6 f32 full-tile temporaries.
    bytes_per_row = c_pad * (4 * itemsize + 6 * 4)
    tb = budget // bytes_per_row
    tb = int(max(sublane, min(4096, (tb // sublane) * sublane)))
    # Don't tile larger than the (sublane-aligned) batch itself.
    tb = min(tb, _round_up(max(batch, 1), sublane))
    return tb


def _jsd_kernel(p_ref, q_ref, out_ref):
    p = p_ref[...].astype(jnp.float32)
    q = q_ref[...].astype(jnp.float32)
    tb = p.shape[0]

    # Numerically stable softmax pieces along the fast (lane) class axis.
    # Class/batch padding is handled by the wrapper's large-negative pad:
    # padded lanes get softmax weight exactly 0; padded rows have p == q => lp == lq.
    p_shift = p - jnp.max(p, axis=-1, keepdims=True)
    q_shift = q - jnp.max(q, axis=-1, keepdims=True)
    ep = jnp.exp(p_shift)                       # reused for both prob and log-softmax
    eq = jnp.exp(q_shift)
    sp = jnp.sum(ep, axis=-1, keepdims=True)
    sq = jnp.sum(eq, axis=-1, keepdims=True)

    lp = p_shift - jnp.log(sp)                  # log_softmax(p)
    lq = q_shift - jnp.log(sq)                  # log_softmax(q)
    prob_p = ep * (1.0 / sp)                    # softmax(p) without re-exponentiating lp
    prob_q = eq * (1.0 / sq)

    # Per-tile JSD contribution (global 0.25/batch scaling applied in the wrapper).
    contrib = (prob_p - prob_q) * (lp - lq)     # (TB, C)

    # Fold sublane row-groups with plain VALU adds (one add per contrib vreg), then do a
    # single tiny cross-lane reduce on the (8, C) slab. Avoids a full-tile (TB,1) XLU reduce.
    folded = contrib[0:8, :]
    for r in range(1, tb // 8):
        folded = folded + contrib[8 * r:8 * (r + 1), :]
    lane_sum = jnp.sum(folded, axis=-1, keepdims=True)          # (8, 1)

    # Lane-dense per-tile output block: partial sums in lane 0, zeros elsewhere.
    lane = jax.lax.broadcasted_iota(jnp.int32, (8, 128), 1)
    out_ref[...] = jnp.where(lane == 0, lane_sum, jnp.float32(0.0))


def jsd(p: jax.Array, q: jax.Array, *, block_rows: int | None = None) -> jax.Array:
    """Jensen-Shannon divergence matching the PyTorch JSD module. Returns a scalar f32."""
    assert p.shape == q.shape, (p.shape, q.shape)
    c = p.shape[-1]
    p2 = p.reshape(-1, c)  # matches p.view(-1, p.size(-1))
    q2 = q.reshape(-1, c)
    if not jnp.issubdtype(p2.dtype, jnp.floating):
        p2 = p2.astype(jnp.float32)
        q2 = q2.astype(jnp.float32)
    b = p2.shape[0]

    itemsize = jnp.dtype(p2.dtype).itemsize
    sublane = _sublane_multiple(p2.dtype)
    c_pad = _round_up(c, 128)
    budget, vmem_limit = _vmem_budgets()

    if block_rows is not None:
        tb = max(sublane, (int(block_rows) // sublane) * sublane)
    else:
        tb = _choose_block_rows(c_pad, itemsize, b, sublane, budget)
    b_pad = _round_up(b, tb)

    if b_pad != b or c_pad != c:
        # Large-negative padding: padded class lanes get zero softmax weight (no in-kernel
        # masking needed); padded batch rows are identical in p and q (zero contribution).
        # NOTE: real -inf logits in user inputs are not handled (inf - inf => NaN).
        neg = -min(1e30, float(jnp.finfo(p2.dtype).max) / 4.0)
        p2 = jnp.pad(p2, ((0, b_pad - b), (0, c_pad - c)), constant_values=neg)
        q2 = jnp.pad(q2, ((0, b_pad - b), (0, c_pad - c)), constant_values=neg)

    num_tiles = b_pad // tb
    grid = (num_tiles,)

    # Deeper pipelining only for the tiny-tile / huge-vocab corner, where short compute
    # bodies expose DMA latency. Not needed (and not used) for normal tile sizes.
    index_map = lambda i: (i, 0)
    if c_pad >= 16384 and tb <= 64 and tb * c_pad * itemsize <= 4 * 1024 * 1024:
        in_spec = pl.BlockSpec((tb, c_pad), index_map, pipeline_mode=pl.Buffered(3))
    else:
        in_spec = pl.BlockSpec((tb, c_pad), index_map)

    # TODO(synk): for very large vocab (>~64k classes) tile the class axis too with an
    #             online log-sum-exp so row tiles stay DMA-efficient on v7x's 64 MiB VMEM.
    partials = pl.pallas_call(
        _jsd_kernel,
        out_shape=jax.ShapeDtypeStruct((num_tiles * 8, 128), jnp.float32),
        grid_spec=pltpu.PrefetchScalarGridSpec(
            num_scalar_prefetch=0,
            grid=grid,
            in_specs=[in_spec, in_spec],
            out_specs=pl.BlockSpec((8, 128), lambda i: (i, 0)),
        ),
        compiler_params=pltpu.CompilerParams(
            dimension_semantics=("parallel",),  # per-tile partial outputs -> megacore on v7x
            vmem_limit_bytes=vmem_limit,
        ),
    )(p2, q2)

    # Final reduction + batchmean scaling in JAX (tiny: num_tiles*8*128 f32).
    return (0.25 / b) * jnp.sum(partials)


def _jsd_ref(p, q):
    """Pure-JAX reference for correctness checking."""
    p2 = p.reshape(-1, p.shape[-1]).astype(jnp.float32)
    q2 = q.reshape(-1, q.shape[-1]).astype(jnp.float32)
    lp = jax.nn.log_softmax(p2, axis=-1)
    lq = jax.nn.log_softmax(q2, axis=-1)
    m = 0.5 * (lp + lq)
    b = p2.shape[0]
    kl_mp = jnp.sum(jnp.exp(lp) * (lp - m)) / b
    kl_mq = jnp.sum(jnp.exp(lq) * (lq - m)) / b
    return 0.5 * (kl_mp + kl_mq)


if __name__ == "__main__":
    key = jax.random.PRNGKey(0)
    kp, kq, kp2, kq2 = jax.random.split(key, 4)

    # Primary small case matching the module's expected (batch, n_classes) inputs.
    batch, n_classes = 8, 32
    p = jax.random.normal(kp, (batch, n_classes), dtype=jnp.float32)
    q = jax.random.normal(kq, (batch, n_classes), dtype=jnp.float32)
    out = jax.block_until_ready(jsd(p, q))
    ref = jax.block_until_ready(_jsd_ref(p, q))
    assert jnp.allclose(out, ref, rtol=1e-5, atol=1e-6), (out, ref)

    # Second case exercising multi-tile parallel partials + batch/class padding (grid of 4).
    p2 = jax.random.normal(kp2, (64, 200), dtype=jnp.float32)
    q2 = jax.random.normal(kq2, (64, 200), dtype=jnp.float32)
    out2 = jax.block_until_ready(jsd(p2, q2, block_rows=16))
    ref2 = jax.block_until_ready(_jsd_ref(p2, q2))
    assert jnp.allclose(out2, ref2, rtol=1e-5, atol=1e-6), (out2, ref2)

    print("KERNEL_OK")
</pallas_src>

<mosaic_0001>
module attributes {stable_mosaic.version = 11 : i64} {
  func.func @_jsd_kernel(%arg0: i32, %arg1: memref<8x128xf32, #tpu.memory_space<vmem>>, %arg2: memref<8x128xf32, #tpu.memory_space<vmem>>, %arg3: memref<8x128xf32, #tpu.memory_space<vmem>>) attributes {dimension_semantics = [#tpu.dimension_semantics<parallel>], iteration_bounds = array<i64: 1>, scalar_prefetch = 0 : i64, scratch_operands = 0 : i64, tpu.core_type = #tpu.core_type<tc>, window_params = [{transform_indices = @transform_0, window_bounds = array<i64: 8, 128>}, {transform_indices = @transform_1, window_bounds = array<i64: 8, 128>}, {transform_indices = @transform_2, window_bounds = array<i64: 8, 128>}]} {
    %c0 = arith.constant 0 : index
    %c0_0 = arith.constant 0 : index
    %0 = vector.load %arg1[%c0, %c0_0] : memref<8x128xf32, #tpu.memory_space<vmem>>, vector<8x128xf32>
    %c0_1 = arith.constant 0 : index
    %c0_2 = arith.constant 0 : index
    %1 = vector.load %arg2[%c0_1, %c0_2] : memref<8x128xf32, #tpu.memory_space<vmem>>, vector<8x128xf32>
    %cst = arith.constant dense<0xFF800000> : vector<8xf32>
    %2 = vector.multi_reduction <maximumf>, %0, %cst [1] : vector<8x128xf32> to vector<8xf32>
    %3 = vector.shape_cast %2 : vector<8xf32> to vector<8x1xf32>
    %4 = vector.broadcast %3 : vector<8x1xf32> to vector<8x128xf32>
    %5 = arith.subf %0, %4 : vector<8x128xf32>
    %cst_3 = arith.constant dense<0xFF800000> : vector<8xf32>
    %6 = vector.multi_reduction <maximumf>, %1, %cst_3 [1] : vector<8x128xf32> to vector<8xf32>
    %7 = vector.shape_cast %6 : vector<8xf32> to vector<8x1xf32>
    %8 = vector.broadcast %7 : vector<8x1xf32> to vector<8x128xf32>
    %9 = arith.subf %1, %8 : vector<8x128xf32>
    %10 = math.exp %5 : vector<8x128xf32>
    %11 = math.exp %9 : vector<8x128xf32>
    %cst_4 = arith.constant dense<0.000000e+00> : vector<8xf32>
    %12 = vector.multi_reduction <add>, %10, %cst_4 [1] : vector<8x128xf32> to vector<8xf32>
    %13 = vector.shape_cast %12 : vector<8xf32> to vector<8x1xf32>
    %cst_5 = arith.constant dense<0.000000e+00> : vector<8xf32>
    %14 = vector.multi_reduction <add>, %11, %cst_5 [1] : vector<8x128xf32> to vector<8xf32>
    %15 = vector.shape_cast %14 : vector<8xf32> to vector<8x1xf32>
    %16 = math.log %13 : vector<8x1xf32>
    %17 = vector.broadcast %16 : vector<8x1xf32> to vector<8x128xf32>
    %18 = arith.subf %5, %17 : vector<8x128xf32>
    %19 = math.log %15 : vector<8x1xf32>
    %20 = vector.broadcast %19 : vector<8x1xf32> to vector<8x128xf32>
    %21 = arith.subf %9, %20 : vector<8x128xf32>
    %cst_6 = arith.constant 1.000000e+00 : f32
    %22 = vector.broadcast %cst_6 : f32 to vector<8x1xf32>
    %23 = arith.divf %22, %13 : vector<8x1xf32>
    %24 = vector.broadcast %23 : vector<8x1xf32> to vector<8x128xf32>
    %25 = arith.mulf %10, %24 : vector<8x128xf32>
    %cst_7 = arith.constant 1.000000e+00 : f32
    %26 = vector.broadcast %cst_7 : f32 to vector<8x1xf32>
    %27 = arith.divf %26, %15 : vector<8x1xf32>
    %28 = vector.broadcast %27 : vector<8x1xf32> to vector<8x128xf32>
    %29 = arith.mulf %11, %28 : vector<8x128xf32>
    %30 = arith.subf %25, %29 : vector<8x128xf32>
    %31 = arith.subf %18, %21 : vector<8x128xf32>
    %32 = arith.mulf %30, %31 : vector<8x128xf32>
    %cst_8 = arith.constant dense<0.000000e+00> : vector<8xf32>
    %33 = vector.multi_reduction <add>, %32, %cst_8 [1] : vector<8x128xf32> to vector<8xf32>
    %34 = vector.shape_cast %33 : vector<8xf32> to vector<8x1xf32>
    %35 = tpu.iota {dimensions = array<i32: 1>} : vector<8x128xi32>
    %c0_i32 = arith.constant 0 : i32
    %36 = vector.broadcast %c0_i32 : i32 to vector<8x128xi32>
    %37 = arith.cmpi eq, %35, %36 : vector<8x128xi32>
    %cst_9 = arith.constant 0.000000e+00 : f32
    %38 = vector.shape_cast %34 : vector<8x1xf32> to vector<8x1xf32>
    %39 = vector.broadcast %38 : vector<8x1xf32> to vector<8x128xf32>
    %40 = vector.broadcast %cst_9 : f32 to vector<8x128xf32>
    %41 = arith.select %37, %39, %40 : vector<8x128xi1>, vector<8x128xf32>
    %c0_10 = arith.constant 0 : index
    %c0_11 = arith.constant 0 : index
    %42 = vector.load %arg3[%c0_10, %c0_11] : memref<8x128xf32, #tpu.memory_space<vmem>>, vector<8x128xf32>
    tpu.vector_store %arg3[%c0_10, %c0_11], %41 {strides = array<i32>} : memref<8x128xf32, #tpu.memory_space<vmem>>, vector<8x128xf32>,
    return
  }
  func.func @transform_0(%arg0: i32) -> (i32, i32) {
    %c0_i32 = arith.constant 0 : i32
    %c0_i32_0 = arith.constant 0 : i32
    return %arg0, %c0_i32 : i32, i32
  }
  func.func @transform_1(%arg0: i32) -> (i32, i32) {
    %c0_i32 = arith.constant 0 : i32
    %c0_i32_0 = arith.constant 0 : i32
    return %arg0, %c0_i32 : i32, i32
  }
  func.func @transform_2(%arg0: i32) -> (i32, i32) {
    %c0_i32 = arith.constant 0 : i32
    %c0_i32_0 = arith.constant 0 : i32
    return %arg0, %c0_i32 : i32, i32
  }
}

</mosaic_0001>

<bundles_post_ra>
// kernel: tpu_custom_call.1
= control target key start
LH: loop header
LB: loop body
LE: loop exit
PB: predicated region body
PF: predicated region fallthrough
CT: control target
= control target key end

     0   :  { %7 = vsyncpa [#allocation3], 0  ;;  %s231_s0 = inlined_call_operand.hbm [shape: f32[8,128], index: 0, kind: input, shape index: {}]   ;;  %s232_s1 = inlined_call_operand.hbm [shape: f32[8,128], index: 1, kind: input, shape index: {}]   ;;  %s233_s2 = inlined_call_operand.hbm [shape: f32[8,128], index: 2, kind: output, shape index: {}]  }
   0x1   :  { %8 = vsyncpa [#allocation6], 0 }
   0x2   :  { %9 = vsyncpa [#allocation4], 0  ;;  %s177_s9 = smov [#allocation2]   ;;  %s178_s11 = smov [#allocation5]  }
   0x3   :  { %s16_s10 = sshll.u32 %s177_s9, 4  ;;  %s26_s12 = sshll.u32 %s178_s11, 4  ;;  %s17_s10 = int_to_ptr.vmem [resolvable:$true] %s16_s10  ;;  %s27_s12 = int_to_ptr.vmem [resolvable:$true] %s26_s12 }
   0x4   :  { %s105_s15 = scalar_lea.hbm %s231_s0, 128 }
   0x5   :  { %p106_p0 = scmp.ne.s32.totalorder %s231_s0, %s105_s15  ;;  %p109_p1 = scmp.lt.u32.totalorder %s105_s15, %s231_s0 }
   0x7   :  { %p111_p2 = pnand %p109_p1, %p106_p0 }
   0x9   :  { %114 = shalt.err (!%p111_p2)
}
   0xa   :  { %s115_s20 = scalar_lea.vmem %s17_s10, 128  ;;  %p120_p4 = scmp.lt.s32.totalorder %s17_s10, %s17_s10 }
   0xb   :  { %p116_p3 = scmp.ne.s32.totalorder %s17_s10, %s115_s20  ;;  %p121_p5 = scmp.lt.s32.totalorder %s115_s20, %s115_s20 }
   0xd   :  { %p122_p6 = por %p121_p5, %p120_p4 }
   0xf   :  { %p123_p7 = pnand %p122_p6, %p116_p3 }
  0x11   :  { %126 = shalt.err (!%p123_p7)
}
  0x12   :  { %19 = dma.hbm_to_vmem [thread:$0]  %s231_s0, 128, %s17_s10, [#allocation3]  }
  0x13   :  { %s127_s25 = scalar_lea.hbm %s232_s1, 128 }
  0x14   :  { %p128_p8 = scmp.ne.s32.totalorder %s232_s1, %s127_s25  ;;  %p131_p9 = scmp.lt.u32.totalorder %s127_s25, %s232_s1 }
  0x16   :  { %p133_p10 = pnand %p131_p9, %p128_p8 }
  0x18   :  { %136 = shalt.err (!%p133_p10)
}
  0x19   :  { %s137_s30 = scalar_lea.vmem %s27_s12, 128  ;;  %p142_p12 = scmp.lt.s32.totalorder %s27_s12, %s27_s12 }
  0x1a   :  { %p138_p11 = scmp.ne.s32.totalorder %s27_s12, %s137_s30  ;;  %p143_p13 = scmp.lt.s32.totalorder %s137_s30, %s137_s30 }
  0x1c   :  { %p144_p0 = por %p143_p13, %p142_p12 }
  0x1e   :  { %p145_p1 = pnand %p144_p0, %p138_p11 }
  0x20   :  { %148 = shalt.err (!%p145_p1)
}
  0x21   :  { %29 = dma.hbm_to_vmem [thread:$0]  %s232_s1, 128, %s27_s12, [#allocation6]  }
  0x22   :  { %171 = dma.done.wait [#allocation3], 128  }
  0x23   :  { %172 = vsyncadd [#allocation3], 4294967168 }
  0x24   :  { %173 = dma.done.wait [#allocation6], 128  }
  0x25   :  { %174 = vsyncadd [#allocation6], 4294967168  ;;  %v36_v0 = vld [vmem:[#allocation2] sm:$0xff]  ;;  %v37_v1 = vld [vmem:[#allocation5] sm:$0xff]  ;;  %v69_v25 = vlaneseq  ;;  %s179_s1 = smov [#allocation7]  }
  0x26   :  { %38 = vmax.xlane.f32.xlu0 %v36_v0  ;;  %s80_s4 = sshll.u32 %s179_s1, 4  ;;  %s81_s4 = int_to_ptr.vmem [resolvable:$true] %s80_s4 }
  0x27   :  { %v70_v26 = vand.u32 127, %v69_v25  ;;  %s149_s5 = scalar_lea.vmem %s81_s4, 128  ;;  %p154_p3 = scmp.lt.s32.totalorder %s81_s4, %s81_s4 }
  0x28   :  { %p150_p2 = scmp.ne.s32.totalorder %s81_s4, %s149_s5  ;;  %p155_p4 = scmp.lt.s32.totalorder %s149_s5, %s149_s5 }
  0x29   :  { %vm71_vm0 = vcmp.eq.s32.totalorder %v70_v26, 0 }
  0x2a   :  { %41 = vmax.xlane.f32.xlu0 %v37_v1  ;;  %p156_p5 = por %p155_p4, %p154_p3 }
  0x2c   :  { %p157_p6 = pnand %p156_p5, %p150_p2 }
  0xb3   :  { %v39_v2 = vpop.xlane.xlu0 %38 }
  0xb4   :  { %v40_v3 = vsub.f32 %v36_v0, %v39_v2 }
  0xb6   :  { %v44_v4 = vmul.f32 1.442695, %v40_v3 }
  0xb7   :  { %v42_v5 = vpop.xlane.xlu0 %41 }
  0xb8   :  { %93 = vpow2.f32 %v44_v4  ;;  %v43_v6 = vsub.f32 %v37_v1, %v42_v5 }
  0xba   :  { %v46_v7 = vmul.f32 1.442695, %v43_v6 }
  0xbc   :  { %95 = vpow2.f32 %v46_v7 }
  0xc2   :  { %v94_v8 = vpop.eup %93 }
  0xc3   :  { %48 = vadd.xlane.f32.xlu1 %v94_v8 }
  0xc6   :  { %v96_v9 = vpop.eup %95 }
  0xc7   :  { %50 = vadd.xlane.f32.xlu1 %v96_v9 }
 0x150   :  { %v49_v10 = vpop.xlane.xlu1 %48 }
 0x151   :  { %97 = vlog2.f32 %v49_v10 }
 0x152   :  { %99 = vrcp.f32 %v49_v10 }
 0x154   :  { %v51_v11 = vpop.xlane.xlu1 %50 }
 0x155   :  { %101 = vlog2.f32 %v51_v11 }
 0x156   :  { %103 = vrcp.f32 %v51_v11 }
 0x15b   :  { %v98_v12 = vpop.eup %97 }
 0x15c   :  { %v100_v13 = vpop.eup %99  ;;  %v53_v14 = vmul.f32 0.6931472, %v98_v12 }
 0x15d   :  { %v60_v21 = vmul.f32 %v100_v13, %v94_v8 }
 0x15e   :  { %v54_v20 = vsub.f32 %v40_v3, %v53_v14 }
 0x15f   :  { %v102_v15 = vpop.eup %101 }
 0x160   :  { %v104_v16 = vpop.eup %103  ;;  %v56_v17 = vmul.f32 0.6931472, %v102_v15 }
 0x161   :  { %v63_v18 = vmul.f32 %v104_v16, %v96_v9 }
 0x162   :  { %v57_v19 = vsub.f32 %v43_v6, %v56_v17 }
 0x163   :  { %v64_v22 = vsub.f32 %v60_v21, %v63_v18 }
 0x164   :  { %v65_v23 = vsub.f32 %v54_v20, %v57_v19 }
 0x166   :  { %v66_v24 = vmul.f32 %v65_v23, %v64_v22 }
 0x168   :  { %67 = vadd.xlane.f32.xlu0 %v66_v24 }
 0x1f5   :  { %v68_v27 = vpop.xlane.xlu0 %67 }
 0x1f6   :  { %v72_v28 = vsel %vm71_vm0, %v68_v27, 0.0 }
 0x1f7   :  { %73 = vst [vmem:[#allocation7] sm:$0xff] %v72_v28 }
 0x1f8   :  { %160 = shalt.err (!%p157_p6)
}
 0x1f9   :  { %s161_s8 = scalar_lea.hbm %s233_s2, 128 }
 0x1fa   :  { %p162_p7 = scmp.ne.s32.totalorder %s233_s2, %s161_s8  ;;  %p165_p8 = scmp.lt.u32.totalorder %s161_s8, %s233_s2 }
 0x1fc   :  { %p167_p9 = pnand %p165_p8, %p162_p7 }
 0x1fe   :  { %170 = shalt.err (!%p167_p9)
}
 0x1ff   :  { %83 = dma.vmem_to_hbm [thread:$0]  %s81_s4, 128, %s233_s2, [#allocation4]  }
 0x200   :  { %175 = dma.done.wait [#allocation4], 128  }
 0x201   :  { %176 = vsyncadd [#allocation4], 4294967168 }
 0x202   :  { %87 = vsyncpa [#allocation3], 1 }
 0x203   :  { %88 = vsyncpa [#allocation6], 1 }
 0x204   :  { %89 = vsyncpa [#allocation4], 1 }

</bundles_post_ra>
